<compile_context>
chip_gen: v7x
topology: tpu7x:2x2x1
jax: 0.10.0
libtpu: 0.0.40
codegen_flags: <defaults>
</compile_context>

<pallas_src>
import functools

import jax
import jax.numpy as jnp
from jax.experimental import pallas as pl
from jax.experimental.pallas import tpu as pltpu


# ---------------------------------------------------------------------------
# helpers
# ---------------------------------------------------------------------------
def _round_up(x: int, m: int) -> int:
    return ((x + m - 1) // m) * m


# Fixed batch buckets -> bounded number of compiled variants (no per-batch
# retrace), larger batches round up to multiples of 2048.
_BATCH_BUCKETS = (8, 32, 128, 512, 2048)


def _bucket_batch(batch: int) -> int:
    for b in _BATCH_BUCKETS:
        if batch <= b:
            return b
    return _round_up(batch, 2048)


def _pick_batch_tile(bp: int) -> int:
    """Tile so the grid has >= 4 steps (2 tiles per v7x TC), tb capped at 2048."""
    if bp <= 8:
        return 8
    return min(2048, max(8, bp // 4))   # bp is a bucket -> tb always divides bp


# ---------------------------------------------------------------------------
# kernel: policy (mu) head only -- the value head is dead work for the wrapper
# ---------------------------------------------------------------------------
def _policy_kernel(obs_ref, w1_ref, b1_ref, w2_ref, b2_ref, wmu_ref, bmu_ref,
                   mu_ref):
    h1 = jnp.tanh(
        jnp.dot(obs_ref[...], w1_ref[...], preferred_element_type=jnp.float32)
        + b1_ref[...]
    )
    h2 = jnp.tanh(
        jnp.dot(h1, w2_ref[...], preferred_element_type=jnp.float32)
        + b2_ref[...]
    )
    mu_ref[...] = (
        jnp.dot(h2, wmu_ref[...], preferred_element_type=jnp.float32)
        + bmu_ref[...]
    )


@functools.partial(jax.jit, static_argnames=("tb",))
def _policy_pallas(obs_p, w1, b1, w2, b2, wmu, bmu, *, tb):
    bp, obs_dim = obs_p.shape
    hp = w1.shape[1]
    action_dim = wmu.shape[1]
    grid = (bp // tb,)                       # bucketing guarantees bp % tb == 0

    # VMEM budget: double-buffered obs/mu tiles + resident (double-buffered)
    # weights + the h1/h2 intermediates + compiler-internal scratch slack.
    tile_bytes = (tb * obs_dim + tb * action_dim) * 4
    weight_bytes = (obs_dim * hp + hp * hp + hp * action_dim
                    + 2 * hp + action_dim) * 4
    interm_bytes = 2 * tb * hp * 4
    vmem_limit = 2 * (tile_bytes + weight_bytes) + interm_bytes + (4 << 20)
    vmem_limit = min(max(int(vmem_limit), 8 << 20), 48 << 20)

    flops = 2 * bp * (obs_dim * hp + hp * hp + hp * action_dim)
    cost = pl.CostEstimate(
        flops=flops,
        transcendentals=2 * bp * hp,                       # two tanh layers
        bytes_accessed=4 * bp * (obs_dim + action_dim) + weight_bytes,
    )

    pinned = lambda i: (0, 0)                # weights/biases stay resident
    tiled = lambda i: (i, 0)                 # batch-tiled arrays

    return pl.pallas_call(
        _policy_kernel,
        out_shape=jax.ShapeDtypeStruct((bp, action_dim), jnp.float32),
        grid=grid,
        in_specs=[
            pl.BlockSpec((tb, obs_dim), tiled),        # obs tile (unpadded K)
            pl.BlockSpec((obs_dim, hp), pinned),       # W1 (rows unpadded)
            pl.BlockSpec((1, hp), pinned),             # b1
            pl.BlockSpec((hp, hp), pinned),            # W2
            pl.BlockSpec((1, hp), pinned),             # b2
            pl.BlockSpec((hp, action_dim), pinned),    # Wmu (cols unpadded)
            pl.BlockSpec((1, action_dim), pinned),     # bmu
        ],
        out_specs=pl.BlockSpec((tb, action_dim), tiled),
        compiler_params=pltpu.CompilerParams(
            dimension_semantics=("parallel",),   # shard batch tiles across TCs
            vmem_limit_bytes=vmem_limit,
        ),
        cost_estimate=cost,
    )(obs_p, w1, b1, w2, b2, wmu, bmu)


# ---------------------------------------------------------------------------
# parameter init (logical shapes) + one-time hidden-dim padding
# ---------------------------------------------------------------------------
def init_params(key, obs_dim, hidden, action_dim):
    ks = jax.random.split(key, 4)
    scale = 0.1
    return {
        "w1": scale * jax.random.normal(ks[0], (obs_dim, hidden), jnp.float32),
        "b1": jnp.zeros((1, hidden), jnp.float32),
        "w2": scale * jax.random.normal(ks[1], (hidden, hidden), jnp.float32),
        "b2": jnp.zeros((1, hidden), jnp.float32),
        "wmu": scale * jax.random.normal(ks[2], (hidden, action_dim), jnp.float32),
        "bmu": jnp.zeros((1, action_dim), jnp.float32),
        "wv": scale * jax.random.normal(ks[3], (hidden, 1), jnp.float32),
        "bv": jnp.zeros((1, 1), jnp.float32),
    }


def prepare_params(params):
    """Pad only the hidden axes to a multiple of 128 (weights are tiny and
    h1/h2 never touch HBM).  obs feature rows of W1 and action columns of Wmu
    stay at their logical sizes so the HBM streams are not inflated."""
    obs_dim, hidden = params["w1"].shape
    action_dim = params["wmu"].shape[1]
    hp = _round_up(hidden, 128)

    def pad2(x, r, c):
        return jnp.pad(x, ((0, r - x.shape[0]), (0, c - x.shape[1])))

    return {
        "w1": pad2(params["w1"], obs_dim, hp),
        "b1": pad2(params["b1"], 1, hp),
        "w2": pad2(params["w2"], hp, hp),
        "b2": pad2(params["b2"], 1, hp),
        "wmu": pad2(params["wmu"], hp, action_dim),
        "bmu": params["bmu"],
        "obs_dim": obs_dim,
        "hidden": hidden,
        "action_dim": action_dim,
        "hp": hp,
    }


# ---------------------------------------------------------------------------
# ModelWrapper.forward equivalent: return model(obs)[0]  (policy head only)
# ---------------------------------------------------------------------------
def model_wrapper_forward(obs, prepared, action=None):
    # TODO(synk): the action-conditioned branch would forward `action` to the
    # wrapped (arbitrary) model; with this concrete actor-critic MLP the
    # observation-only path is the meaningful one.
    del action

    batch, obs_dim = obs.shape
    assert obs_dim == prepared["obs_dim"]

    bp = _bucket_batch(batch)
    tb = _pick_batch_tile(bp)

    obs_p = obs.astype(jnp.float32)
    if bp != batch:
        # Row pad only when the batch does not hit its bucket exactly; the
        # feature axis is never padded.
        obs_p = jnp.pad(obs_p, ((0, bp - batch), (0, 0)))

    mu = _policy_pallas(
        obs_p,
        prepared["w1"], prepared["b1"],
        prepared["w2"], prepared["b2"],
        prepared["wmu"], prepared["bmu"],
        tb=tb,
    )
    if bp != batch:
        mu = mu[:batch]
    return mu


# ---------------------------------------------------------------------------
# pure-JAX reference (unpadded)
# ---------------------------------------------------------------------------
def _reference(obs, params):
    h1 = jnp.tanh(obs @ params["w1"] + params["b1"])
    h2 = jnp.tanh(h1 @ params["w2"] + params["b2"])
    return h2 @ params["wmu"] + params["bmu"]


if __name__ == "__main__":
    key = jax.random.PRNGKey(0)
    k_obs, k_par = jax.random.split(key)

    B, OBS_DIM, HIDDEN, ACTION_DIM = 8, 32, 32, 8
    obs = jax.random.normal(k_obs, (B, OBS_DIM), jnp.float32)
    params = init_params(k_par, OBS_DIM, HIDDEN, ACTION_DIM)
    prepared = prepare_params(params)

    out = model_wrapper_forward(obs, prepared)
    out = jax.block_until_ready(out)

    ref = _reference(obs, params)
    assert out.shape == (B, ACTION_DIM)
    assert jnp.allclose(out, ref, atol=1e-5, rtol=1e-5)

    print("KERNEL_OK")
</pallas_src>

<mosaic_0001>
module attributes {stable_mosaic.version = 11 : i64} {
  func.func @_policy_kernel(%arg0: i32, %arg1: memref<8x32xf32, #tpu.memory_space<vmem>>, %arg2: memref<32x128xf32, #tpu.memory_space<vmem>>, %arg3: memref<1x128xf32, #tpu.memory_space<vmem>>, %arg4: memref<128x128xf32, #tpu.memory_space<vmem>>, %arg5: memref<1x128xf32, #tpu.memory_space<vmem>>, %arg6: memref<128x8xf32, #tpu.memory_space<vmem>>, %arg7: memref<1x8xf32, #tpu.memory_space<vmem>>, %arg8: memref<8x8xf32, #tpu.memory_space<vmem>>) attributes {dimension_semantics = [#tpu.dimension_semantics<parallel>], iteration_bounds = array<i64: 1>, scalar_prefetch = 0 : i64, scratch_operands = 0 : i64, tpu.core_type = #tpu.core_type<tc>, window_params = [{transform_indices = @transform_0, window_bounds = array<i64: 8, 32>}, {pipeline_mode = #tpu.pipeline_mode<synchronous>, transform_indices = @transform_1, window_bounds = array<i64: 32, 128>}, {pipeline_mode = #tpu.pipeline_mode<synchronous>, transform_indices = @transform_2, window_bounds = array<i64: 1, 128>}, {pipeline_mode = #tpu.pipeline_mode<synchronous>, transform_indices = @transform_3, window_bounds = array<i64: 128, 128>}, {pipeline_mode = #tpu.pipeline_mode<synchronous>, transform_indices = @transform_4, window_bounds = array<i64: 1, 128>}, {pipeline_mode = #tpu.pipeline_mode<synchronous>, transform_indices = @transform_5, window_bounds = array<i64: 128, 8>}, {pipeline_mode = #tpu.pipeline_mode<synchronous>, transform_indices = @transform_6, window_bounds = array<i64: 1, 8>}, {transform_indices = @transform_7, window_bounds = array<i64: 8, 8>}]} {
    %c0 = arith.constant 0 : index
    %c0_0 = arith.constant 0 : index
    %0 = vector.load %arg1[%c0, %c0_0] : memref<8x32xf32, #tpu.memory_space<vmem>>, vector<8x32xf32>
    %c0_1 = arith.constant 0 : index
    %c0_2 = arith.constant 0 : index
    %1 = vector.load %arg2[%c0_1, %c0_2] : memref<32x128xf32, #tpu.memory_space<vmem>>, vector<32x128xf32>
    %cst = arith.constant dense<0.000000e+00> : vector<8x128xf32>
    %2 = tpu.matmul %0, %1, %cst {dimension_numbers = #tpu.dot_dimension_numbers<[1], [0], [0], [1], [0, 0, 1, 1], [], []>} : vector<8x32xf32>, vector<32x128xf32>, vector<8x128xf32> -> vector<8x128xf32>
    %c0_3 = arith.constant 0 : index
    %c0_4 = arith.constant 0 : index
    %3 = vector.load %arg3[%c0_3, %c0_4] : memref<1x128xf32, #tpu.memory_space<vmem>>, vector<1x128xf32>
    %4 = vector.broadcast %3 : vector<1x128xf32> to vector<8x128xf32>
    %5 = arith.addf %2, %4 : vector<8x128xf32>
    %6 = math.tanh %5 : vector<8x128xf32>
    %c0_5 = arith.constant 0 : index
    %c0_6 = arith.constant 0 : index
    %7 = vector.load %arg4[%c0_5, %c0_6] : memref<128x128xf32, #tpu.memory_space<vmem>>, vector<128x128xf32>
    %cst_7 = arith.constant dense<0.000000e+00> : vector<8x128xf32>
    %8 = tpu.matmul %6, %7, %cst_7 {dimension_numbers = #tpu.dot_dimension_numbers<[1], [0], [0], [1], [0, 0, 1, 1], [], []>} : vector<8x128xf32>, vector<128x128xf32>, vector<8x128xf32> -> vector<8x128xf32>
    %c0_8 = arith.constant 0 : index
    %c0_9 = arith.constant 0 : index
    %9 = vector.load %arg5[%c0_8, %c0_9] : memref<1x128xf32, #tpu.memory_space<vmem>>, vector<1x128xf32>
    %10 = vector.broadcast %9 : vector<1x128xf32> to vector<8x128xf32>
    %11 = arith.addf %8, %10 : vector<8x128xf32>
    %12 = math.tanh %11 : vector<8x128xf32>
    %c0_10 = arith.constant 0 : index
    %c0_11 = arith.constant 0 : index
    %13 = vector.load %arg6[%c0_10, %c0_11] : memref<128x8xf32, #tpu.memory_space<vmem>>, vector<128x8xf32>
    %cst_12 = arith.constant dense<0.000000e+00> : vector<8x8xf32>
    %14 = tpu.matmul %12, %13, %cst_12 {dimension_numbers = #tpu.dot_dimension_numbers<[1], [0], [0], [1], [0, 0, 1, 1], [], []>} : vector<8x128xf32>, vector<128x8xf32>, vector<8x8xf32> -> vector<8x8xf32>
    %c0_13 = arith.constant 0 : index
    %c0_14 = arith.constant 0 : index
    %15 = vector.load %arg7[%c0_13, %c0_14] : memref<1x8xf32, #tpu.memory_space<vmem>>, vector<1x8xf32>
    %16 = vector.broadcast %15 : vector<1x8xf32> to vector<8x8xf32>
    %17 = arith.addf %14, %16 : vector<8x8xf32>
    %c0_15 = arith.constant 0 : index
    %c0_16 = arith.constant 0 : index
    %18 = vector.load %arg8[%c0_15, %c0_16] : memref<8x8xf32, #tpu.memory_space<vmem>>, vector<8x8xf32>
    tpu.vector_store %arg8[%c0_15, %c0_16], %17 {strides = array<i32>} : memref<8x8xf32, #tpu.memory_space<vmem>>, vector<8x8xf32>,
    return
  }
  func.func @transform_0(%arg0: i32) -> (i32, i32) {
    %c0_i32 = arith.constant 0 : i32
    %c0_i32_0 = arith.constant 0 : i32
    return %arg0, %c0_i32 : i32, i32
  }
  func.func @transform_1(%arg0: i32) -> (i32, i32) {
    %c0_i32 = arith.constant 0 : i32
    %c0_i32_0 = arith.constant 0 : i32
    %c0_i32_1 = arith.constant 0 : i32
    return %c0_i32, %c0_i32_0 : i32, i32
  }
  func.func @transform_2(%arg0: i32) -> (i32, i32) {
    %c0_i32 = arith.constant 0 : i32
    %c0_i32_0 = arith.constant 0 : i32
    %c0_i32_1 = arith.constant 0 : i32
    return %c0_i32, %c0_i32_0 : i32, i32
  }
  func.func @transform_3(%arg0: i32) -> (i32, i32) {
    %c0_i32 = arith.constant 0 : i32
    %c0_i32_0 = arith.constant 0 : i32
    %c0_i32_1 = arith.constant 0 : i32
    return %c0_i32, %c0_i32_0 : i32, i32
  }
  func.func @transform_4(%arg0: i32) -> (i32, i32) {
    %c0_i32 = arith.constant 0 : i32
    %c0_i32_0 = arith.constant 0 : i32
    %c0_i32_1 = arith.constant 0 : i32
    return %c0_i32, %c0_i32_0 : i32, i32
  }
  func.func @transform_5(%arg0: i32) -> (i32, i32) {
    %c0_i32 = arith.constant 0 : i32
    %c0_i32_0 = arith.constant 0 : i32
    %c0_i32_1 = arith.constant 0 : i32
    return %c0_i32, %c0_i32_0 : i32, i32
  }
  func.func @transform_6(%arg0: i32) -> (i32, i32) {
    %c0_i32 = arith.constant 0 : i32
    %c0_i32_0 = arith.constant 0 : i32
    %c0_i32_1 = arith.constant 0 : i32
    return %c0_i32, %c0_i32_0 : i32, i32
  }
  func.func @transform_7(%arg0: i32) -> (i32, i32) {
    %c0_i32 = arith.constant 0 : i32
    %c0_i32_0 = arith.constant 0 : i32
    return %arg0, %c0_i32 : i32, i32
  }
}

</mosaic_0001>

<bundles_post_ra>
// kernel: _policy_pallas.1
= control target key start
LH: loop header
LB: loop body
LE: loop exit
PB: predicated region body
PF: predicated region fallthrough
CT: control target
= control target key end

     0   :  { %12 = vsyncpa [#allocation3], 0  ;;  %s769_s0 = inlined_call_operand.vmem [shape: f32[8,32], index: 0, kind: input, shape index: {}]   ;;  %s770_s1 = inlined_call_operand.hbm [shape: f32[32,128], index: 1, kind: input, shape index: {}]   ;;  %s771_s2 = inlined_call_operand.vmem [shape: f32[1,128], index: 2, kind: input, shape index: {}]   ;;  %s772_s3 = inlined_call_operand.vmem [shape: f32[128,128], index: 3, kind: input, shape index: {}]   ;;  %s773_s4 = inlined_call_operand.vmem [shape: f32[1,128], index: 4, kind: input, shape index: {}]   ;;  %s774_s5 = inlined_call_operand.vmem [shape: f32[128,8], index: 5, kind: input, shape index: {}]   ;;  %s775_s6 = inlined_call_operand.vmem [shape: f32[1,8], index: 6, kind: input, shape index: {}]   ;;  %s776_s7 = inlined_call_operand.hbm [shape: f32[8,8], index: 7, kind: output, shape index: {}]  }
   0x1   :  { %13 = vsyncpa [#allocation4], 0  ;;  %s569_s24 = smov [#allocation2]   ;;  %s521_s28 = scalar_lea.hbm %s770_s1, 512 }
   0x2   :  { %s21_s25 = sshll.u32 %s569_s24, 4  ;;  %p522_p0 = scmp.ne.s32.totalorder %s770_s1, %s521_s28  ;;  %s22_s25 = int_to_ptr.vmem [resolvable:$true] %s21_s25 }
   0x3   :  { %p525_p1 = scmp.lt.u32.totalorder %s521_s28, %s770_s1 }
   0x5   :  { %p527_p2 = pnand %p525_p1, %p522_p0 }
   0x7   :  { %530 = shalt.err (!%p527_p2)
}
   0x8   :  { %s531_s10 = scalar_lea.vmem %s22_s25, 512  ;;  %p536_p4 = scmp.lt.s32.totalorder %s22_s25, %s22_s25 }
   0x9   :  { %p532_p3 = scmp.ne.s32.totalorder %s22_s25, %s531_s10  ;;  %p537_p5 = scmp.lt.s32.totalorder %s531_s10, %s531_s10 }
   0xb   :  { %p538_p6 = por %p537_p5, %p536_p4 }
   0xd   :  { %p539_p7 = pnand %p538_p6, %p532_p3 }
   0xf   :  { %542 = shalt.err (!%p539_p7)
}
  0x10   :  { %s570_s11 = smov 128   ;;  %s571_s12 = smov 8  }
  0x11   :  { %27 = dma.hbm_to_vmem [thread:$0]  %s770_s1, 512, %s22_s25, [#allocation3], %s570_s11, %s570_s11, %s571_s12  }
  0x12   :  { %565 = dma.done.wait [#allocation3], 512  }
  0x13   :  { %566 = vsyncadd [#allocation3], 4294966784  ;;  %v572_v0 = vmov 0.0|0.0   ;;  %vm573_vm0 = vmmov 0   ;;  %v574_v1 = vmov 0.0   ;;  %v42_v2 = vld [vmem:[#allocation2] sm:$0xff] }
  0x14   :  { %456 = vmatprep.subr.bf16.mxu0 %v572_v0  ;;  %383 = vmatprep.mubr.msk.f32.mxu0 %vm573_vm0, %v574_v1  ;;  %v43_v3 = vld [vmem:[#allocation2 + $0x8] sm:$0xff]  ;;  %v44_v4 = vld [vmem:[#allocation2 + $0x10] sm:$0xff]  ;;  %v45_v6 = vld [vmem:[#allocation2 + $0x18] sm:$0xff]  ;;  %vm53_vm1 = vcmask 261120   ;;  %vm315_vm2 = vcmask 64512  }
  0x15   :  { %462 = vmatprep.subr.bf16.mxu1 %v572_v0  ;;  %418 = vmatprep.mubr.msk.f32.mxu1 %vm573_vm0, %v574_v1  ;;  %v457_v5 = vpack.c.bf16 %v43_v3, %v42_v2  ;;  %v128_v7 = vld [vmem:[%s772_s3] sm:$0xff]  ;;  %v129_v8 = vld [vmem:[%s772_s3 + $0x8] sm:$0xff]  ;;  %v130_v9 = vld [vmem:[%s772_s3 + $0x10] sm:$0xff]  ;;  %v460_v11 = vpack.c.bf16 %v45_v6, %v44_v4 }
  0x16   :  { %v131_v10 = vld [vmem:[%s772_s3 + $0x18] sm:$0xff]  ;;  %v463_v12 = vpack.c.bf16 %v129_v8, %v128_v7  ;;  %v132_v14 = vld [vmem:[%s772_s3 + $0x20] sm:$0xff]  ;;  %v133_v15 = vld [vmem:[%s772_s3 + $0x28] sm:$0xff] }
  0x17   :  { %458 = vmatpush3.bf16.msra.mxu0 %v457_v5  ;;  %v466_v13 = vpack.c.bf16 %v131_v10, %v130_v9  ;;  %v41_v16 = vld [vmem:[%s769_s0] sm:$0xff]  ;;  %v469_v17 = vpack.c.bf16 %v133_v15, %v132_v14  ;;  %v134_v18 = vld [vmem:[%s772_s3 + $0x30] sm:$0xff]  ;;  %v135_v19 = vld [vmem:[%s772_s3 + $0x38] sm:$0xff] }
  0x18   :  { %459 = vmatprep.subr.bf16.mxu0 %v572_v0  ;;  %464 = vmatpush3.bf16.msra.mxu1 %v463_v12  ;;  %v472_v20 = vpack.c.bf16 %v135_v19, %v134_v18  ;;  %v136_v21 = vld [vmem:[%s772_s3 + $0x40] sm:$0xff]  ;;  %v137_v22 = vld [vmem:[%s772_s3 + $0x48] sm:$0xff]  ;;  %v138_v24 = vld [vmem:[%s772_s3 + $0x50] sm:$0xff] }
  0x19   :  { %465 = vmatprep.subr.bf16.mxu1 %v572_v0  ;;  %v475_v23 = vpack.c.bf16 %v137_v22, %v136_v21  ;;  %v139_v25 = vld [vmem:[%s772_s3 + $0x58] sm:$0xff]  ;;  %v140_v27 = vld [vmem:[%s772_s3 + $0x60] sm:$0xff]  ;;  %v141_v28 = vld [vmem:[%s772_s3 + $0x68] sm:$0xff] }
  0x1a   :  { %v478_v26 = vpack.c.bf16 %v139_v25, %v138_v24  ;;  %v481_v29 = vpack.c.bf16 %v141_v28, %v140_v27  ;;  %v142_v30 = vld [vmem:[%s772_s3 + $0x70] sm:$0xff]  ;;  %v143_v31 = vld [vmem:[%s772_s3 + $0x78] sm:$0xff]  ;;  %v222_v33 = vld [vmem:[%s774_s5] sm:$0xff] }
  0x1b   :  { %461 = vmatpush3.bf16.msra.mxu0 %v460_v11  ;;  %v484_v32 = vpack.c.bf16 %v143_v31, %v142_v30  ;;  %v223_v34 = vld [vmem:[%s774_s5 + $0x8] sm:$0xff]  ;;  %v224_v35 = vld [vmem:[%s774_s5 + $0x10] sm:$0xff]  ;;  %v225_v37 = vld [vmem:[%s774_s5 + $0x18] sm:$0xff] }
  0x1c   :  { %486 = vmatprep.subr.bf16.mxu0 %v572_v0  ;;  %467 = vmatpush3.bf16.msra.mxu1 %v466_v13  ;;  %v487_v36 = vpack.c.bf16 %v223_v34, %v222_v33  ;;  %v490_v38 = vpack.c.bf16 %v225_v37, %v224_v35  ;;  %v226_v39 = vld [vmem:[%s774_s5 + $0x20] sm:$0xff]  ;;  %v227_v40 = vld [vmem:[%s774_s5 + $0x28] sm:$0xff]  ;;  %v228_v42 = vld [vmem:[%s774_s5 + $0x30] sm:$0xff] }
  0x1d   :  { %468 = vmatprep.subr.bf16.mxu1 %v572_v0  ;;  %v493_v41 = vpack.c.bf16 %v227_v40, %v226_v39  ;;  %v229_v43 = vld [vmem:[%s774_s5 + $0x38] sm:$0xff]  ;;  %v230_v45 = vld [vmem:[%s774_s5 + $0x40] sm:$0xff]  ;;  %v231_v46 = vld [vmem:[%s774_s5 + $0x48] sm:$0xff] }
  0x1e   :  { %384 = vmatmul.mubr.msk.f32.vlgmr.msra.gmra.mrb[0].mxu0 %vm53_vm1, %v41_v16  ;;  %v496_v44 = vpack.c.bf16 %v229_v43, %v228_v42  ;;  %v499_v47 = vpack.c.bf16 %v231_v46, %v230_v45  ;;  %v332_v48 = vld [vmem:[%s771_s2] ss:$0 sm:$0xff]  ;;  %v232_v53 = vld [vmem:[%s774_s5 + $0x50] sm:$0xff]  ;;  %v233_v54 = vld [vmem:[%s774_s5 + $0x58] sm:$0xff] }
  0x1f   :  { %453 = vmatprep.mubr.msk.f32.mxu0 %vm573_vm0, %v574_v1  ;;  %488 = vmatpush3.bf16.msra.mxu0 %v487_v36  ;;  %v502_v55 = vpack.c.bf16 %v233_v54, %v232_v53  ;;  %v234_v56 = vld [vmem:[%s774_s5 + $0x60] sm:$0xff]  ;;  %v235_v57 = vld [vmem:[%s774_s5 + $0x68] sm:$0xff]  ;;  %v236_v59 = vld [vmem:[%s774_s5 + $0x70] sm:$0xff] }
  0x20   :  { %470 = vmatpush3.bf16.msra.mxu1 %v469_v17  ;;  %489 = vmatprep.subr.bf16.mxu0 %v572_v0  ;;  %v505_v58 = vpack.c.bf16 %v235_v57, %v234_v56  ;;  %v237_v60 = vld [vmem:[%s774_s5 + $0x78] sm:$0xff]  ;;  %v334_v62 = vld [vmem:[%s773_s4] ss:$0 sm:$0xff]  ;;  %s575_s5 = smov [#allocation5]  }
  0x21   :  { %471 = vmatprep.subr.bf16.mxu1 %v572_v0  ;;  %v508_v61 = vpack.c.bf16 %v237_v60, %v236_v59  ;;  %v335_v4 = vld [vmem:[%s775_s6] ss:$0 sm:$0xff]  ;;  %s323_s9 = sshll.u32 %s575_s5, 4  ;;  %s324_s9 = int_to_ptr.vmem [resolvable:$true] %s323_s9 }
  0x22   :  { %s543_s10 = scalar_lea.vmem %s324_s9, 128  ;;  %p548_p9 = scmp.lt.s32.totalorder %s324_s9, %s324_s9 }
  0x23   :  { %491 = vmatpush3.bf16.msra.mxu0 %v490_v38  ;;  %p544_p8 = scmp.ne.s32.totalorder %s324_s9, %s543_s10  ;;  %p549_p10 = scmp.lt.s32.totalorder %s543_s10, %s543_s10 }
  0x24   :  { %473 = vmatpush3.bf16.msra.mxu1 %v472_v20  ;;  %492 = vmatprep.subr.bf16.mxu0 %v572_v0 }
  0x25   :  { %474 = vmatprep.subr.bf16.mxu1 %v572_v0  ;;  %p550_p11 = por %p549_p10, %p548_p9 }
  0x27   :  { %494 = vmatpush3.bf16.msra.mxu0 %v493_v41  ;;  %p551_p12 = pnand %p550_p11, %p544_p8 }
  0x28   :  { %476 = vmatpush3.bf16.msra.mxu1 %v475_v23  ;;  %495 = vmatprep.subr.bf16.mxu0 %v572_v0 }
  0x29   :  { %477 = vmatprep.subr.bf16.mxu1 %v572_v0 }
  0x2b   :  { %497 = vmatpush3.bf16.msra.mxu0 %v496_v44 }
  0x2c   :  { %479 = vmatpush3.bf16.msra.mxu1 %v478_v26  ;;  %498 = vmatprep.subr.bf16.mxu0 %v572_v0 }
  0x2d   :  { %480 = vmatprep.subr.bf16.mxu1 %v572_v0 }
  0x2f   :  { %500 = vmatpush3.bf16.msra.mxu0 %v499_v47 }
  0x30   :  { %482 = vmatpush3.bf16.msra.mxu1 %v481_v29  ;;  %501 = vmatprep.subr.bf16.mxu0 %v572_v0 }
  0x31   :  { %483 = vmatprep.subr.bf16.mxu1 %v572_v0 }
  0x33   :  { %503 = vmatpush3.bf16.msra.mxu0 %v502_v55 }
  0x34   :  { %485 = vmatpush3.bf16.msra.mxu1 %v484_v32  ;;  %504 = vmatprep.subr.bf16.mxu0 %v572_v0 }
  0x37   :  { %506 = vmatpush3.bf16.msra.mxu0 %v505_v58 }
  0x38   :  { %507 = vmatprep.subr.bf16.mxu0 %v572_v0 }
  0x3b   :  { %509 = vmatpush3.bf16.msra.mxu0 %v508_v61 }
  0xf1   :  { %v123_v49 = vpop.f32.mrb[0].mxu0 }
  0xf2   :  { %v124_v50 = vadd.f32 %v332_v48, %v123_v49  ;;  %v385_v51 = vpop.f32.mrb[1].mxu0 }
  0xf4   :  { %517 = vtanh.f32 %v124_v50 }
  0xfe   :  { %v518_v52 = vpop.eup %517 }
  0xff   :  { %419 = vmatmul.mubr.f32.vlgmr.msra.gmra.mrb[0].mxu1 %v518_v52 }
 0x1d2   :  { %v217_v63 = vpop.f32.mrb[0].mxu1 }
 0x1d3   :  { %v218_v1 = vadd.f32 %v334_v62, %v217_v63  ;;  %v420_v2 = vpop.f32.mrb[1].mxu1 }
 0x1d5   :  { %519 = vtanh.f32 %v218_v1 }
 0x1df   :  { %v520_v3 = vpop.eup %519 }
 0x1e0   :  { %454 = vmatmul.mubr.f32.vlgmr.msra.gmra.mrb[2].mxu0 %v520_v3 }
 0x2b3   :  { %v311_v5 = vpop.f32.mrb[2].mxu0 }
 0x2b4   :  { %v312_v0 = vadd.f32 %v335_v4, %v311_v5  ;;  %v455_v6 = vpop.f32.mrb[3].mxu0 }
 0x2b6   :  { %316 = vst.msk [vmem:[#allocation5] sm:$0xff] %vm315_vm2, %v312_v0 }
 0x2b7   :  { %554 = shalt.err (!%p551_p12)
}
 0x2b8   :  { %s555_s12 = scalar_lea.hbm %s776_s7, 128 }
 0x2b9   :  { %p556_p13 = scmp.ne.s32.totalorder %s776_s7, %s555_s12  ;;  %p559_p0 = scmp.lt.u32.totalorder %s555_s12, %s776_s7 }
 0x2bb   :  { %p561_p1 = pnand %p559_p0, %p556_p13 }
 0x2bd   :  { %564 = shalt.err (!%p561_p1)
}
 0x2be   :  { %326 = dma.vmem_to_hbm [thread:$0]  %s324_s9, 128, %s776_s7, [#allocation4]  }
 0x2bf   :  { %567 = dma.done.wait [#allocation4], 128  }
 0x2c0   :  { %568 = vsyncadd [#allocation4], 4294967168 }
 0x2c1   :  { %330 = vsyncpa [#allocation3], 1 }
 0x2c2   :  { %331 = vsyncpa [#allocation4], 1 }

</bundles_post_ra>
